<compile_context>
chip_gen: v7x
topology: tpu7x:2x2x1
jax: 0.10.0
libtpu: 0.0.40
codegen_flags: <defaults>
</compile_context>

<pallas_src>
import jax
import jax.numpy as jnp
from jax import lax
from jax.experimental import pallas as pl
from jax.experimental.pallas import tpu as pltpu

EPS = 1e-9


def _make_kernel_body(use_bf16_matmul):
    def ard_kernel_body(x1_ref, x2_ref, ls_ref, sv_ref, o_ref):
        # x1_ref: (tn, D) tile of x1; x2_ref: (tm, D) tile of x2;
        # ls_ref: (1, D) length scales (VMEM); sv_ref: (1,) signal variance (SMEM).
        inv_ls = 1.0 / (jnp.abs(ls_ref[...]) + EPS)            # (1, D)

        a = x1_ref[...] * inv_ls                                # (tn, D) scaled x1 tile
        b = x2_ref[...] * inv_ls                                # (tm, D) scaled x2 tile

        # ||a||^2 per row, kept in (tn, 1) sublane layout.
        sq_a = jnp.sum(a * a, axis=-1, keepdims=True)           # (tn, 1)

        # ||b||^2 per row, produced directly in (1, tm) lane layout on the MXU
        # (no (tm,1) -> (1,tm) transpose on the XLU).
        ones_row = jnp.ones((1, b.shape[-1]), dtype=jnp.float32)
        sq_b = lax.dot_general(
            ones_row, b * b,
            dimension_numbers=(((1,), (1,)), ((), ())),
            preferred_element_type=jnp.float32,
        )                                                       # (1, tm)

        if use_bf16_matmul:
            # Opt-in: faster MXU path on bf16-native MXUs; loosens accuracy.
            a_mm = a.astype(jnp.bfloat16)
            b_mm = b.astype(jnp.bfloat16)
        else:
            a_mm, b_mm = a, b
        ab = lax.dot_general(
            a_mm, b_mm,
            dimension_numbers=(((1,), (1,)), ((), ())),
            preferred_element_type=jnp.float32,
        )                                                       # (tn, tm)

        sqdist = jnp.maximum(sq_a + sq_b - 2.0 * ab, 0.0)       # clamp tiny negatives
        sv = jnp.abs(sv_ref[0])                                 # scalar from SMEM
        o_ref[...] = (sv * jnp.exp(-0.5 * sqdist)).astype(o_ref.dtype)

    return ard_kernel_body


def _round_up(x, m):
    return ((x + m - 1) // m) * m


def _vmem_capacity_bytes():
    # Generation-aware VMEM capacity (v5e/v6e: 128 MiB, v7x: 64 MiB per TC).
    try:
        return int(pltpu.get_tpu_info().vmem_capacity_bytes)
    except Exception:
        return 64 * 1024 * 1024  # conservative fallback (v7x per-TC)


def _select_tiles(N, M, D, tile_budget_bytes):
    """Pick (tn, tm) maximizing tile size under the double-buffered VMEM budget."""
    tn = min(512, _round_up(N, 8))
    tm = min(2048, _round_up(M, 128))

    def footprint(a, b):
        # 2x double-buffered f32: x1 tile, x2 tile, output tile.
        return 2 * 4 * (a * D + b * D + a * b)

    while footprint(tn, tm) > tile_budget_bytes and (tn > 8 or tm > 128):
        if tm > 128 and (tm >= 2 * tn or tn <= 8):
            tm = max(128, tm // 2)
        elif tn > 8:
            tn = max(8, tn // 2)
        else:
            tm = max(128, tm // 2)

    # Megacore (v7x): guarantee >=2 blocks along at least one parallel axis
    # whenever the problem is splittable, so both TensorCores get work.
    if -(-N // tn) == 1 and -(-M // tm) == 1:
        if N > 8:
            tn = _round_up(-(-N // 2), 8)
        elif M > 128:
            tm = _round_up(-(-M // 2), 128)
    return tn, tm


def ard_forward(x1, x2, length_scales, signal_variance, *, tn=None, tm=None,
                out_dtype=jnp.float32, use_bf16_matmul=False):
    """Pallas implementation of ARDKernel.forward.

    x1: (N, D), x2: (M, D), length_scales: (D,), signal_variance: (1,)
    Returns K: (N, M) in `out_dtype` (default float32).
    """
    N, D = x1.shape
    M, D2 = x2.shape
    assert D == D2, "x1 and x2 must share the feature dimension"

    x1 = x1.astype(jnp.float32)
    x2 = x2.astype(jnp.float32)
    ls2 = length_scales.reshape(1, D).astype(jnp.float32)
    sv1 = signal_variance.reshape(1).astype(jnp.float32)

    vmem_cap = _vmem_capacity_bytes()
    tile_budget = int(vmem_cap * 0.55)
    vmem_limit = min(int(vmem_cap * 0.80), 100 * 1024 * 1024)

    auto_tn, auto_tm = _select_tiles(N, M, D, tile_budget)
    if tn is None:
        tn = auto_tn
    if tm is None:
        tm = auto_tm
    tn = max(8, _round_up(tn, 8))
    tm = max(128, _round_up(tm, 128))

    grid = (pl.cdiv(N, tn), pl.cdiv(M, tm))

    out = pl.pallas_call(
        _make_kernel_body(use_bf16_matmul),
        out_shape=jax.ShapeDtypeStruct((N, M), out_dtype),
        grid_spec=pltpu.PrefetchScalarGridSpec(
            num_scalar_prefetch=0,
            grid=grid,
            in_specs=[
                pl.BlockSpec((tn, D), lambda i, j: (i, 0)),   # x1 row tile
                pl.BlockSpec((tm, D), lambda i, j: (j, 0)),   # x2 row tile
                pl.BlockSpec((1, D), lambda i, j: (0, 0)),    # length scales
                pl.BlockSpec(memory_space=pltpu.MemorySpace.SMEM),  # signal variance
            ],
            out_specs=pl.BlockSpec((tn, tm), lambda i, j: (i, j)),
        ),
        compiler_params=pltpu.CompilerParams(
            dimension_semantics=("parallel", "parallel"),
            vmem_limit_bytes=vmem_limit,
        ),
    )(x1, x2, ls2, sv1)
    return out


def ard_reference(x1, x2, length_scales, signal_variance):
    # Pure-JAX reference mirroring the PyTorch module (exact pairwise diffs).
    ls = jnp.abs(length_scales) + EPS
    a = x1 / ls
    b = x2 / ls
    diff = a[:, None, :] - b[None, :, :]
    sqdist = jnp.sum(diff * diff, axis=-1)
    return jnp.abs(signal_variance[0]) * jnp.exp(-0.5 * sqdist)


if __name__ == "__main__":
    initial_length_scale = 1.0
    initial_signal_variance = 1.0
    key = jax.random.PRNGKey(0)

    # --- small demo shapes consistent with the module: x1 (N, D), x2 (M, D) ---
    N, M, D = 16, 8, 32
    k1, k2 = jax.random.split(key)
    x1 = jax.random.normal(k1, (N, D), dtype=jnp.float32)
    x2 = jax.random.normal(k2, (M, D), dtype=jnp.float32)
    length_scales = jnp.ones((D,), dtype=jnp.float32) * initial_length_scale
    signal_variance = jnp.array([initial_signal_variance], dtype=jnp.float32)

    out = ard_forward(x1, x2, length_scales, signal_variance)
    out = jax.block_until_ready(out)
    ref = ard_reference(x1, x2, length_scales, signal_variance)
    assert out.shape == (N, M)
    assert jnp.allclose(out, ref, atol=1e-5, rtol=1e-4), "mismatch vs reference (small)"

    # --- second check: multi-tile 2D grid with ragged (masked) edge blocks ---
    N2, M2, D2 = 272, 260, 32
    k3, k4 = jax.random.split(k2)
    x1b = jax.random.normal(k3, (N2, D2), dtype=jnp.float32)
    x2b = jax.random.normal(k4, (M2, D2), dtype=jnp.float32)
    ls_b = jnp.ones((D2,), dtype=jnp.float32) * 0.7
    sv_b = jnp.array([1.3], dtype=jnp.float32)

    out2 = ard_forward(x1b, x2b, ls_b, sv_b, tn=128, tm=128)
    out2 = jax.block_until_ready(out2)
    ref2 = ard_reference(x1b, x2b, ls_b, sv_b)
    assert out2.shape == (N2, M2)
    assert jnp.allclose(out2, ref2, atol=1e-5, rtol=1e-4), "mismatch vs reference (tiled)"

    # --- third check: auto tile selection path (big tiles, >=2 parallel blocks) ---
    out3 = ard_forward(x1b, x2b, ls_b, sv_b)
    out3 = jax.block_until_ready(out3)
    assert jnp.allclose(out3, ref2, atol=1e-5, rtol=1e-4), "mismatch vs reference (auto)"

    print("KERNEL_OK")
</pallas_src>

<mosaic_0001>
module attributes {stable_mosaic.version = 11 : i64} {
  func.func @ard_kernel_body(%arg0: i32, %arg1: i32, %arg2: memref<8x32xf32, #tpu.memory_space<vmem>>, %arg3: memref<128x32xf32, #tpu.memory_space<vmem>>, %arg4: memref<1x32xf32, #tpu.memory_space<vmem>>, %arg5: memref<1xf32, #tpu.memory_space<smem>>, %arg6: memref<8x128xf32, #tpu.memory_space<vmem>>) attributes {dimension_semantics = [#tpu.dimension_semantics<parallel>, #tpu.dimension_semantics<parallel>], iteration_bounds = array<i64: 2, 1>, scalar_prefetch = 0 : i64, scratch_operands = 0 : i64, tpu.core_type = #tpu.core_type<tc>, window_params = [{transform_indices = @transform_0, window_bounds = array<i64: 8, 32>}, {transform_indices = @transform_1, window_bounds = array<i64: 128, 32>}, {pipeline_mode = #tpu.pipeline_mode<synchronous>, transform_indices = @transform_2, window_bounds = array<i64: 1, 32>}, {transform_indices = @transform_3, window_bounds = array<i64: 1>}, {transform_indices = @transform_4, window_bounds = array<i64: 8, 128>}]} {
    %c0 = arith.constant 0 : index
    %c0_0 = arith.constant 0 : index
    %0 = vector.load %arg4[%c0, %c0_0] : memref<1x32xf32, #tpu.memory_space<vmem>>, vector<1x32xf32>
    %1 = math.absf %0 : vector<1x32xf32>
    %cst = arith.constant 9.99999971E-10 : f32
    %2 = vector.broadcast %cst : f32 to vector<1x32xf32>
    %3 = arith.addf %1, %2 : vector<1x32xf32>
    %cst_1 = arith.constant 1.000000e+00 : f32
    %4 = vector.broadcast %cst_1 : f32 to vector<1x32xf32>
    %5 = arith.divf %4, %3 : vector<1x32xf32>
    %c0_2 = arith.constant 0 : index
    %c0_3 = arith.constant 0 : index
    %6 = vector.load %arg2[%c0_2, %c0_3] : memref<8x32xf32, #tpu.memory_space<vmem>>, vector<8x32xf32>
    %7 = vector.broadcast %5 : vector<1x32xf32> to vector<8x32xf32>
    %8 = arith.mulf %6, %7 : vector<8x32xf32>
    %c0_4 = arith.constant 0 : index
    %c0_5 = arith.constant 0 : index
    %9 = vector.load %arg3[%c0_4, %c0_5] : memref<128x32xf32, #tpu.memory_space<vmem>>, vector<128x32xf32>
    %10 = vector.broadcast %5 : vector<1x32xf32> to vector<128x32xf32>
    %11 = arith.mulf %9, %10 : vector<128x32xf32>
    %12 = arith.mulf %8, %8 : vector<8x32xf32>
    %cst_6 = arith.constant dense<0.000000e+00> : vector<8xf32>
    %13 = vector.multi_reduction <add>, %12, %cst_6 [1] : vector<8x32xf32> to vector<8xf32>
    %14 = vector.shape_cast %13 : vector<8xf32> to vector<8x1xf32>
    %cst_7 = arith.constant 1.000000e+00 : f32
    %15 = vector.broadcast %cst_7 : f32 to vector<1x32xf32>
    %16 = arith.mulf %11, %11 : vector<128x32xf32>
    %cst_8 = arith.constant dense<0.000000e+00> : vector<1x128xf32>
    %17 = tpu.matmul %15, %16, %cst_8 {dimension_numbers = #tpu.dot_dimension_numbers<[1], [1], [0], [0], [0, 0, 1, 0], [], []>} : vector<1x32xf32>, vector<128x32xf32>, vector<1x128xf32> -> vector<1x128xf32>
    %cst_9 = arith.constant dense<0.000000e+00> : vector<8x128xf32>
    %18 = tpu.matmul %8, %11, %cst_9 {dimension_numbers = #tpu.dot_dimension_numbers<[1], [1], [0], [0], [0, 0, 1, 0], [], []>} : vector<8x32xf32>, vector<128x32xf32>, vector<8x128xf32> -> vector<8x128xf32>
    %19 = vector.broadcast %14 : vector<8x1xf32> to vector<8x128xf32>
    %20 = vector.broadcast %17 : vector<1x128xf32> to vector<8x128xf32>
    %21 = arith.addf %19, %20 : vector<8x128xf32>
    %cst_10 = arith.constant 2.000000e+00 : f32
    %22 = vector.broadcast %cst_10 : f32 to vector<8x128xf32>
    %23 = arith.mulf %22, %18 : vector<8x128xf32>
    %24 = arith.subf %21, %23 : vector<8x128xf32>
    %cst_11 = arith.constant 0.000000e+00 : f32
    %25 = vector.broadcast %cst_11 : f32 to vector<8x128xf32>
    %26 = arith.maximumf %24, %25 : vector<8x128xf32>
    %c0_12 = arith.constant 0 : index
    %27 = memref.load %arg5[%c0_12] : memref<1xf32, #tpu.memory_space<smem>>
    %28 = math.absf %27 : f32
    %cst_13 = arith.constant -5.000000e-01 : f32
    %29 = vector.broadcast %cst_13 : f32 to vector<8x128xf32>
    %30 = arith.mulf %29, %26 : vector<8x128xf32>
    %31 = math.exp %30 : vector<8x128xf32>
    %32 = vector.broadcast %28 : f32 to vector<8x128xf32>
    %33 = arith.mulf %32, %31 : vector<8x128xf32>
    %c0_14 = arith.constant 0 : index
    %c0_15 = arith.constant 0 : index
    %34 = vector.load %arg6[%c0_14, %c0_15] : memref<8x128xf32, #tpu.memory_space<vmem>>, vector<8x128xf32>
    tpu.vector_store %arg6[%c0_14, %c0_15], %33 {strides = array<i32>} : memref<8x128xf32, #tpu.memory_space<vmem>>, vector<8x128xf32>,
    return
  }
  func.func @transform_0(%arg0: i32, %arg1: i32) -> (i32, i32) {
    %c0_i32 = arith.constant 0 : i32
    %c0_i32_0 = arith.constant 0 : i32
    return %arg0, %c0_i32 : i32, i32
  }
  func.func @transform_1(%arg0: i32, %arg1: i32) -> (i32, i32) {
    %c0_i32 = arith.constant 0 : i32
    %c0_i32_0 = arith.constant 0 : i32
    return %arg1, %c0_i32 : i32, i32
  }
  func.func @transform_2(%arg0: i32, %arg1: i32) -> (i32, i32) {
    %c0_i32 = arith.constant 0 : i32
    %c0_i32_0 = arith.constant 0 : i32
    %c0_i32_1 = arith.constant 0 : i32
    return %c0_i32, %c0_i32_0 : i32, i32
  }
  func.func @transform_3(%arg0: i32, %arg1: i32) -> i32 {
    %c0_i32 = arith.constant 0 : i32
    %c0_i32_0 = arith.constant 0 : i32
    return %c0_i32 : i32
  }
  func.func @transform_4(%arg0: i32, %arg1: i32) -> (i32, i32) {
    %c0_i32 = arith.constant 0 : i32
    return %arg0, %arg1 : i32, i32
  }
}

</mosaic_0001>

<bundles_post_ra>
// kernel: tpu_custom_call.1
= control target key start
LH: loop header
LB: loop body
LE: loop exit
PB: predicated region body
PF: predicated region fallthrough
CT: control target
= control target key end

     0   :  { %s1358_s0 = inlined_call_operand.hbm [shape: f32[16,32], index: 0, kind: input, shape index: {}]   ;;  %s1359_s1 = inlined_call_operand.hbm [shape: f32[8,32], index: 1, kind: input, shape index: {}]   ;;  %s1360_s2 = inlined_call_operand.vmem [shape: f32[1,32], index: 2, kind: input, shape index: {}]   ;;  %s1361_s3 = inlined_call_operand.<no memory space> [shape: f32[1], index: 3, kind: input, shape index: {}]   ;;  %s1362_s4 = inlined_call_operand.vmem [shape: f32[16,8], index: 4, kind: output, shape index: {}]  }
   0x1   :  { %9 = sst [smem:[#allocation2]] %s1361_s3 }
   0x2   :  { %10 = vsyncpa [#allocation4], 0 }
   0x3   :  { %12 = vsyncpa [#allocation4 + $0x1], 0 }
   0x4   :  { %13 = vsyncpa [#allocation6], 0  ;;  %s1111_s17 = smov 0   ;;  %s1113_s18 = smov 0  }
   0x5   :  { %s1115_s19 = smov 0   ;;  %s1117_s20 = smov 0  }
   0x6   :  { %s1119_s21 = smov 0   ;;  %s1121_s22 = smov 0  }
   0x7 LB: > { %s683_s3 = sadd.s32 4294967295, %s1073_s22   ;;  %s31_s23 = sadd.s32 1, %s1069_s21  ;;  %s1073_s22 = sphi %s1121_s22, %s19_s22   ;;  %s1069_s21 = sphi %s1119_s21, %s1379_s21   ;;  %s1065_s20 = sphi %s1117_s20, %s1378_s20   ;;  %s1061_s19 = sphi %s1115_s19, %s1377_s19   ;;  %s1057_s18 = sphi %s1113_s18, %s1376_s18   ;;  %s1053_s17 = sphi %s1111_s17, %s1375_s17  }
   0x8   : > { %p33_p0 = scmp.ge.s32.totalorder %s31_s23, 2  ;;  %s38_s24 = sadd.s32 1, %s1061_s19 }
   0x9   : > { %p45_p1 = scmp.ne.s32.totalorder %s1061_s19, %s1057_s18  ;;  %p46_p2 = scmp.eq.s32.totalorder %s1073_s22, 0 }
   0xa   : > { %s1381_s23 = smov (%p33_p0, %s31_s23), 0  ;;  %p51_p4 = scmp.ne.s32.totalorder %s1057_s18, %s1053_s17 }
   0xb   : > { %p1147_p3 = por %p46_p2, %p45_p1  ;;  %s35_s26 = ssub.s32 %s1069_s21, %s1381_s23 }
   0xc   : > { %p1154_p5 = scmp.eq.s32.totalorder %s683_s3, 0  ;;  %p36_p6 = scmp.eq.s32.totalorder %s35_s26, 0 }
   0xd   : > { %p685_p7 = scmp.ge.s32.totalorder %s1073_s22, 1  ;;  %p158_p9 = scmp.lt.s32.totalorder %s1073_s22, 3 }
   0xe   : > { %s1367_s27 = scalar_select %p1154_p5, 1, 0 }
   0xf   : > { %p1161_p8 = por %p1154_p5, %p51_p4  ;;  %p1169_p10 = pnand %p685_p7, %p158_p9 }
  0x10   : > { %s1167_s29 = scalar_select %p36_p6, %s1061_s19, %s38_s24  }
  0x11   : > { %s1368_s28 = scalar_select %p1161_p8, 1, 0 }
  0x12   : > { %162 = sbr.rel (%p1169_p10) target bundleno = 50 (0x32), region = 12  ;;  %p686_p11 = scmp.ne.s32.totalorder (!%p1169_p10), %s683_s3, 0 }
  0x19   : > { %166 = sbr.rel (%p686_p11) target bundleno = 50 (0x32), region = 16 }
  0x20   : > { %172 = vsyncadd [#allocation6], 1920  ;;  %s1075_s5 = smov [#allocation5]   ;;  %s967_s9 = scalar_lea.hbm %s1359_s1, 128 }
  0x21   : > { %s177_s6 = sshll.u32 %s1075_s5, 4  ;;  %p968_p12 = scmp.ne.s32.totalorder %s1359_s1, %s967_s9  ;;  %s178_s6 = int_to_ptr.vmem [resolvable:$true] %s177_s6 }
  0x22   : > { %p971_p13 = scmp.lt.u32.totalorder %s967_s9, %s1359_s1 }
  0x24   : > { %p973_p0 = pnand %p971_p13, %p968_p12 }
  0x26   : > { %976 = shalt.err (!%p973_p0)
}
  0x27   : > { %s977_s14 = scalar_lea.vmem %s178_s6, 128  ;;  %s981_s15 = scalar_lea.vmem %s178_s6, 2048 }
  0x28   : > { %p978_p1 = scmp.ne.s32.totalorder %s178_s6, %s977_s14  ;;  %p982_p2 = scmp.lt.s32.totalorder %s178_s6, %s178_s6 }
  0x29   : > { %p983_p4 = scmp.lt.s32.totalorder %s981_s15, %s977_s14 }
  0x2b   : > { %p984_p6 = por %p983_p4, %p982_p2 }
  0x2d   : > { %p985_p7 = pnand %p984_p6, %p978_p1 }
  0x2f   : > { %988 = shalt.err (!%p985_p7)
}
  0x30   : > { %s1076_s16 = smov 128   ;;  %s1077_s17 = smov 8  }
  0x31   : > { %183 = dma.hbm_to_vmem [thread:$0]  %s1359_s1, 128, %s178_s6, [#allocation6], %s1076_s16, %s1076_s16, %s1077_s17  }
  0x32 PF: > { %p906_p9 = scmp.lt.s32.totalorder %s1073_s22, 2  ;;  %s197_s26 = sand.u32 1, %s1061_s19  }
  0x33   : > { %s689_s5 = sshll.u32 %s1069_s21, 7  ;;  %s688_s7 = sshll.u32 %s197_s26, 3 }
  0x34   : > { %s1193_s10 = scalar_lea.hbm %s1358_s0, %s689_s5  ;;  %s201_s6 = scalar_lea.vmem [#allocation3], %s688_s7 }
  0x35   : > { %s208_s11 = sshll.u32 %s201_s6, 4  ;;  %p1197_p11 = pnand %p906_p9, %p1147_p3  ;;  %s1201_s11 = int_to_ptr.vmem [resolvable:$true] %s208_s11 }
  0x36   : > { %s198_s13 = scalar_lea.sflag [#allocation4], %s197_s26  ;;  %s989_s14 = scalar_lea.hbm %s1193_s10, 128 }
  0x37   : > { %p990_p12 = scmp.ne.s32.totalorder %s1193_s10, %s989_s14  ;;  %p991_p13 = pneg %p1197_p11 }
  0x38   : > { %s994_s25 = scalar_lea.hbm %s1358_s0, 256  ;;  %p995_p3 = scmp.lt.u32.totalorder %s1193_s10, %s1358_s0 }
  0x39   : > { %p992_p0 = pnand %p991_p13, %p990_p12  ;;  %p996_p2 = scmp.lt.u32.totalorder %s994_s25, %s989_s14 }
  0x3a   : > { %p998_p6 = scmp.lt.u32.totalorder %s989_s14, %s1193_s10 }
  0x3b   : > { %p993_p1 = pneg %p992_p0  ;;  %p997_p4 = por %p996_p2, %p995_p3 }
  0x3d   : > { %p999_p7 = por %p998_p6, %p997_p4 }
  0x3f   : > { %p1000_p9 = pnand %p999_p7, %p993_p1 }
  0x41   : > { %1003 = shalt.err (!%p1000_p9)
}
  0x42   : > { %s1004_s24 = scalar_lea.vmem %s1201_s11, 128  ;;  %s1078_s26 = smov [#allocation3]  }
  0x43   : > { %p1005_p12 = scmp.ne.s32.totalorder %s1201_s11, %s1004_s24  ;;  %s1009_s5 = sshll.u32 %s1078_s26, 4  ;;  %s1010_s5 = int_to_ptr.vmem [resolvable:$false] %s1009_s5 }
  0x44   : > { %s1011_s7 = scalar_lea.vmem %s1010_s5, 256  ;;  %p1012_p8 = scmp.lt.s32.totalorder %s1201_s11, %s1010_s5 }
  0x45   : > { %p1007_p0 = pnand %p1005_p12, %p991_p13  ;;  %p1013_p3 = scmp.lt.s32.totalorder %s1011_s7, %s1004_s24 }
  0x47   : > { %p1008_p5 = pneg %p1007_p0  ;;  %p1014_p2 = por %p1013_p3, %p1012_p8 }
  0x49   : > { %p1015_p4 = pnand %p1014_p2, %p1008_p5 }
  0x4b   : > { %1018 = shalt.err (!%p1015_p4)
}
  0x4c   : > { %905 = dma.hbm_to_vmem [thread:$0]  (!%p1197_p11), %s1193_s10, 128, %s1201_s11, %s198_s13  }
  0x4d   : > { %217 = sbr.rel (%p1169_p10) target bundleno = 414 (0x19e), region = 36  ;;  %s219_s8 = sand.u32 (!%p1169_p10), 1, %s1057_s18  }
  0x4e   : > { %s1231_s9 = sshll.u32 (!%p1169_p10), %s219_s8, 3  ;;  %s220_s6 = scalar_lea.sflag (!%p1169_p10), [#allocation4], %s219_s8 }
  0x4f   : > { %s223_s14 = scalar_lea.vmem (!%p1169_p10), [#allocation3], %s1231_s9  ;;  %p1371_p13 = scmp.ne.s32.totalorder (!%p1169_p10), %s1368_s28, 0 }
  0x54   : > { %1044 = dma.done.wait (%p1371_p13), %s220_s6, 128  }
  0x55   : > { %1046 = vsyncadd (%p1371_p13), %s220_s6, 4294967168  ;;  %p1372_p5 = scmp.ne.s32.totalorder %s1367_s27, 0 }
  0x57   : > { %1048 = dma.done.wait (%p1372_p5), [#allocation6], 2048  }
  0x58   : > { %1050 = vsyncadd (%p1372_p5), [#allocation6], 4294965248  ;;  %v1079_v0 = vmov 0.0|0.0   ;;  %vm1080_vm0 = vmmov 0   ;;  %v1081_v1 = vmov 0.0   ;;  %v271_v5 = vlaneseq  ;;  %v277_v9 = vld [vmem:[#allocation5] sm:$0xff] }
  0x59   : > { %834 = vmatprep.subr.bf16.mxu0 %v1079_v0  ;;  %866 = vmatprep.subr.bf16.mxu1 %v1079_v0  ;;  %v264_v2 = vld [vmem:[%s1360_s2] sm:$0x1]  ;;  %v278_v10 = vld [vmem:[#allocation5 + $0x8] sm:$0xff]  ;;  %vm310_vm1 = vcmask 261120   ;;  %v280_v13 = vld [vmem:[#allocation5 + $0x18] sm:$0xff]  ;;  %s580_s27 = sld [smem:[#allocation2]] }
  0x5a   : > { %796 = vmatprep.mubr.msk.f32.mxu0 %vm1080_vm0, %v1081_v1  ;;  %831 = vmatprep.mubr.msk.f32.mxu1 %vm1080_vm0, %v1081_v1  ;;  %v265_v3 = vand.u32 2147483647, %v264_v2  ;;  %v1247_v6 = vshrl.u32 %v271_v5, 7  ;;  %v279_v12 = vld [vmem:[#allocation5 + $0x10] sm:$0xff]  ;;  %vm1258_vm2 = vmpackc.low %vm310_vm1, %vm310_vm1  ;;  %v281_v25 = vld [vmem:[#allocation5 + $0x20] sm:$0xff]  ;;  %p257_p8 = scmp.lt.s32.totalorder %s1065_s20, 1 }
  0x5b   : > { %v282_v26 = vld [vmem:[#allocation5 + $0x28] sm:$0xff]  ;;  %v269_v28 = vld [vmem:[%s223_s14] sm:$0xff]  ;;  %v285_v45 = vld [vmem:[#allocation5 + $0x40] sm:$0xff] }
  0x5c   : > { %v266_v4 = vadd.f32 1e-09, %v265_v3  ;;  %v273_v7 = vsub.s32 0, %v1247_v6  ;;  %v283_v36 = vld [vmem:[#allocation5 + $0x30] sm:$0xff]  ;;  %v284_v37 = vld [vmem:[#allocation5 + $0x38] sm:$0xff]  ;;  %v286_v46 = vld [vmem:[#allocation5 + $0x48] sm:$0xff] }
  0x5d   : > { %v287_v53 = vld [vmem:[#allocation5 + $0x50] sm:$0xff]  ;;  %v288_v54 = vld [vmem:[#allocation5 + $0x58] sm:$0xff]  ;;  %v289_v61 = vld [vmem:[#allocation5 + $0x60] sm:$0xff]  ;;  %s1383_s20 = smov (!%p257_p8, %s1065_s20), 1 }
  0x5e   : > { %963 = vrcp.f32 %v266_v4  ;;  %v290_v62 = vld [vmem:[#allocation5 + $0x68] sm:$0xff]  ;;  %s693_s11 = sshll.u32 %s1383_s20, 3 }
  0x5f   : > { %s581_s28 = sand.u32 2147483647, %s580_s27  ;;  %s263_s15 = scalar_lea.vmem %s1362_s4, %s693_s11 }
  0x68   : > { %v964_v8 = vpop.eup %963 }
  0x69   : > { %v1252_v11 = vrot.slane %v964_v8, %v273_v7  ;;  %v291_v8 = vld [vmem:[#allocation5 + $0x70] sm:$0xff] }
  0x6b   : > { %v293_v14 = vmul.f32 %v277_v9, %v1252_v11  ;;  %v294_v15 = vmul.f32 %v278_v10, %v1252_v11  ;;  %v295_v17 = vmul.f32 %v279_v12, %v1252_v11  ;;  %v296_v21 = vmul.f32 %v280_v13, %v1252_v11  ;;  %v292_v9 = vld [vmem:[#allocation5 + $0x78] sm:$0xff] }
  0x6c   : > { %v297_v30 = vmul.f32 %v281_v25, %v1252_v11  ;;  %v298_v31 = vmul.f32 %v282_v26, %v1252_v11  ;;  %v1275_v32 = vmul.f32 %v1252_v11, %v269_v28  ;;  %v299_v41 = vmul.f32 %v283_v36, %v1252_v11 }
  0x6d   : > { %v314_v18 = vmul.f32 %v293_v14, %v293_v14  ;;  %v315_v19 = vmul.f32 %v294_v15, %v294_v15  ;;  %v867_v20 = vpack.c.bf16 %v294_v15, %v293_v14  ;;  %v316_v23 = vmul.f32 %v295_v17, %v295_v17 }
  0x6e   : > { %v317_v24 = vmul.f32 %v296_v21, %v296_v21  ;;  %v871_v27 = vpack.c.bf16 %v296_v21, %v295_v17  ;;  %v309_v33 = vmul.f32 %v1275_v32, %v1275_v32  ;;  %v318_v34 = vmul.f32 %v297_v30, %v297_v30 }
  0x6f   : > { %v835_v22 = vpack.c.bf16 %v315_v19, %v314_v18  ;;  %869 = vmatpush3.bf16.xpose.msk.msra.mxu1 %vm1258_vm2, %v867_v20  ;;  %v319_v35 = vmul.f32 %v298_v31, %v298_v31  ;;  %v875_v39 = vpack.c.bf16 %v298_v31, %v297_v30  ;;  %v300_v42 = vmul.f32 %v284_v37, %v1252_v11 }
  0x70   : > { %870 = vmatprep.subr.bf16.mxu1 %v1079_v0  ;;  %v839_v29 = vpack.c.bf16 %v317_v24, %v316_v23  ;;  %v311_v38 = vsel %vm310_vm1, %v309_v33, 0.0  ;;  %v320_v43 = vmul.f32 %v299_v41, %v299_v41  ;;  %v301_v49 = vmul.f32 %v285_v45, %v1252_v11 }
  0x71   : > { %837 = vmatpush3.bf16.xpose.msk.msra.mxu0 %vm1258_vm2, %v835_v22  ;;  %312 = vadd.xlane.f32.xlu0 %v311_v38  ;;  %v843_v40 = vpack.c.bf16 %v319_v35, %v318_v34  ;;  %v321_v44 = vmul.f32 %v300_v42, %v300_v42  ;;  %v879_v47 = vpack.c.bf16 %v300_v42, %v299_v41  ;;  %v585_v30 = vstv %s581_s28 }
  0x72   : > { %838 = vmatprep.subr.bf16.mxu0 %v1079_v0  ;;  %v302_v50 = vmul.f32 %v286_v46, %v1252_v11  ;;  %v322_v51 = vmul.f32 %v301_v49, %v301_v49  ;;  %v303_v57 = vmul.f32 %v287_v53, %v1252_v11  ;;  %v304_v58 = vmul.f32 %v288_v54, %v1252_v11 }
  0x73   : > { %v847_v48 = vpack.c.bf16 %v321_v44, %v320_v43  ;;  %v305_v2 = vmul.f32 %v289_v61, %v1252_v11  ;;  %v306_v3 = vmul.f32 %v290_v62, %v1252_v11  ;;  %v307_v13 = vmul.f32 %v291_v8, %v1252_v11 }
  0x74   : > { %v323_v52 = vmul.f32 %v302_v50, %v302_v50  ;;  %v883_v55 = vpack.c.bf16 %v302_v50, %v301_v49  ;;  %v324_v59 = vmul.f32 %v303_v57, %v303_v57  ;;  %v325_v60 = vmul.f32 %v304_v58, %v304_v58 }
  0x75   : > { %v887_v63 = vpack.c.bf16 %v304_v58, %v303_v57  ;;  %v326_v4 = vmul.f32 %v305_v2, %v305_v2  ;;  %v327_v5 = vmul.f32 %v306_v3, %v306_v3  ;;  %v891_v10 = vpack.c.bf16 %v306_v3, %v305_v2 }
  0x76   : > { %v851_v56 = vpack.c.bf16 %v323_v52, %v322_v51  ;;  %v855_v1 = vpack.c.bf16 %v325_v60, %v324_v59  ;;  %v308_v14 = vmul.f32 %v292_v9, %v1252_v11  ;;  %v328_v15 = vmul.f32 %v307_v13, %v307_v13 }
  0x77   : > { %873 = vmatpush3.bf16.xpose.msk.msra.mxu1 %vm1258_vm2, %v871_v27  ;;  %v859_v12 = vpack.c.bf16 %v327_v5, %v326_v4  ;;  %v1082_v11 = vmov 1.0  }
  0x78   : > { %874 = vmatprep.subr.bf16.mxu1 %v1079_v0  ;;  %v329_v17 = vmul.f32 %v308_v14, %v308_v14  ;;  %v895_v18 = vpack.c.bf16 %v308_v14, %v307_v13 }
  0x79   : > { %841 = vmatpush3.bf16.xpose.msk.msra.mxu0 %vm1258_vm2, %v839_v29 }
  0x7a   : > { %842 = vmatprep.subr.bf16.mxu0 %v1079_v0  ;;  %v863_v19 = vpack.c.bf16 %v329_v17, %v328_v15 }
  0x7f   : > { %877 = vmatpush3.bf16.xpose.msk.msra.mxu1 %vm1258_vm2, %v875_v39 }
  0x80   : > { %878 = vmatprep.subr.bf16.mxu1 %v1079_v0 }
  0x81   : > { %845 = vmatpush3.bf16.xpose.msk.msra.mxu0 %vm1258_vm2, %v843_v40 }
  0x82   : > { %846 = vmatprep.subr.bf16.mxu0 %v1079_v0 }
  0x87   : > { %881 = vmatpush3.bf16.xpose.msk.msra.mxu1 %vm1258_vm2, %v879_v47 }
  0x88   : > { %882 = vmatprep.subr.bf16.mxu1 %v1079_v0 }
  0x89   : > { %849 = vmatpush3.bf16.xpose.msk.msra.mxu0 %vm1258_vm2, %v847_v48 }
  0x8a   : > { %850 = vmatprep.subr.bf16.mxu0 %v1079_v0 }
  0x8f   : > { %885 = vmatpush3.bf16.xpose.msk.msra.mxu1 %vm1258_vm2, %v883_v55 }
  0x90   : > { %886 = vmatprep.subr.bf16.mxu1 %v1079_v0 }
  0x91   : > { %853 = vmatpush3.bf16.xpose.msk.msra.mxu0 %vm1258_vm2, %v851_v56 }
  0x92   : > { %854 = vmatprep.subr.bf16.mxu0 %v1079_v0 }
  0x97   : > { %889 = vmatpush3.bf16.xpose.msk.msra.mxu1 %vm1258_vm2, %v887_v63 }
  0x98   : > { %890 = vmatprep.subr.bf16.mxu1 %v1079_v0 }
  0x99   : > { %857 = vmatpush3.bf16.xpose.msk.msra.mxu0 %vm1258_vm2, %v855_v1 }
  0x9a   : > { %858 = vmatprep.subr.bf16.mxu0 %v1079_v0 }
  0x9f   : > { %893 = vmatpush3.bf16.xpose.msk.msra.mxu1 %vm1258_vm2, %v891_v10 }
  0xa0   : > { %894 = vmatprep.subr.bf16.mxu1 %v1079_v0 }
  0xa1   : > { %861 = vmatpush3.bf16.xpose.msk.msra.mxu0 %vm1258_vm2, %v859_v12 }
  0xa2   : > { %862 = vmatprep.subr.bf16.mxu0 %v1079_v0 }
  0xa7   : > { %897 = vmatpush3.bf16.xpose.msk.msra.mxu1 %vm1258_vm2, %v895_v18 }
  0xa9   : > { %865 = vmatpush3.bf16.xpose.msk.msra.mxu0 %vm1258_vm2, %v863_v19 }
  0xae   : > { %832 = vmatmul.mubr.msk.f32.vlgmr.msra.gmra.mrb[0].mxu1 %vm310_vm1, %v1275_v32 }
  0xb0   : > { %797 = vmatmul.mubr.msk.f32.vlgmr.msra.gmra.mrb[0].mxu0 %vm310_vm1, %v1082_v11 }
  0xfe   : > { %v313_v0 = vpop.xlane.xlu0 %312 }
 0x181   : > { %v568_v20 = vpop.f32.mrb[0].mxu1 }
 0x182   : > { %v833_v21 = vpop.f32.mrb[1].mxu1  ;;  %v577_v25 = vmul.f32 2.0, %v568_v20 }
 0x183   : > { %v447_v22 = vpop.f32.mrb[0].mxu0 }
 0x184   : > { %v575_v23 = vrot.slane %v447_v22, %v273_v7  ;;  %v798_v24 = vpop.f32.mrb[1].mxu0 }
 0x186   : > { %v576_v26 = vadd.f32 %v575_v23, %v313_v0 }
 0x188   : > { %v578_v16 = vsub.f32 %v576_v26, %v577_v25 }
 0x18a   : > { %v579_v27 = vmax.f32 %v578_v16, 0.0 }
 0x18c   : > { %v582_v28 = vmul.f32 -0.5, %v579_v27 }
 0x18e   : > { %v583_v29 = vmul.f32 1.442695, %v582_v28 }
 0x190   : > { %965 = vpow2.f32 %v583_v29 }
 0x19a   : > { %v966_v31 = vpop.eup %965 }
 0x19b   : > { %v586_v6 = vmul.f32 %v966_v31, %v585_v30 }
 0x19d   : > { %587 = vst [vmem:[%s263_s15] sm:$0xff] %v586_v6 }
 0x19e PF: > { %s19_s22 = sadd.s32 1, %s1073_s22   ;;  %s1375_s17 = smov %s1057_s18 }
 0x19f   : > { %p16_p10 = scmp.ge.s32.totalorder %s19_s22, 4   ;;  %s1376_s18 = smov %s1061_s19 }
 0x1a0   : > { %s1377_s19 = smov %s1167_s29  ;;  %s1378_s20 = smov %s1069_s21 }
 0x1a1   : > { %s1379_s21 = smov %s1381_s23  ;;  %18 = sbr.rel (!%p16_p10) target bundleno = 7 (0x7), region = 81 }
 0x1a8   :  { %613 = vsyncpa [#allocation4], 1 }
 0x1a9   :  { %615 = vsyncpa [#allocation4 + $0x1], 1 }
 0x1aa   :  { %616 = vsyncpa [#allocation6], 1 }

</bundles_post_ra>
